<compile_context>
chip_gen: v6e
topology: v6e:2x2x1
jax: 0.10.0
libtpu: 0.0.40
codegen_flags: <defaults>
</compile_context>

<pallas_src>
import jax
import jax.numpy as jnp
from jax.experimental import pallas as pl
from jax.experimental.pallas import tpu as pltpu


def _leaky_relu(v, slope=0.2):
    return jnp.where(v > 0, v, slope * v)


def _round_up(n, m):
    return ((n + m - 1) // m) * m


# ----------------------------- forward kernel ------------------------------
def mine_fwd_kernel(x_ref, y_ref, w1x_ref, w1y_ref, b1_ref, w2_ref, b2_ref,
                    w3r_ref, b3_ref, o_ref):
    # layer 1: x@w1x + y@w1y + b1 fused in-kernel (no wrapper-side concat / extra HBM pass)
    h = jnp.dot(x_ref[...], w1x_ref[...], preferred_element_type=jnp.float32)
    h = h + jnp.dot(y_ref[...], w1y_ref[...], preferred_element_type=jnp.float32)
    h = _leaky_relu(h + b1_ref[...])
    # layer 2
    h = _leaky_relu(jnp.dot(h, w2_ref[...], preferred_element_type=jnp.float32)
                    + b2_ref[...])
    # layer 3: N=1 -> VPU multiply + cross-lane sum (MXU pass would waste 127/255 cols)
    t = jnp.sum(h * w3r_ref[...], axis=-1, keepdims=True) + b3_ref[0]
    o_ref[...] = _leaky_relu(t).astype(o_ref.dtype)


@jax.jit
def mine_forward(x, y, params):
    """x: [B, x_size], y: [B, y_size] -> [B, 1] (matches Mine.forward)."""
    B, x_size = x.shape
    y_size = y.shape[1]
    H = params["w2"].shape[0]

    # Large batch tiles to amortize per-step pipeline overhead; >=2 tiles for B>256 so
    # the "parallel" axis can shard across v7x's two TensorCores.
    MAX_TILE = 8192
    if B <= 256:
        block_b = B
    else:
        block_b = min(MAX_TILE, _round_up(pl.cdiv(B, 2), 128))
    grid = (pl.cdiv(B, block_b),)

    flops = 2 * B * (x_size * H + y_size * H + H * H + H)
    bytes_accessed = 4 * (B * (x_size + y_size + 1) + (x_size + y_size + H + 4) * H)

    return pl.pallas_call(
        mine_fwd_kernel,
        out_shape=jax.ShapeDtypeStruct((B, 1), jnp.float32),
        grid=grid,
        in_specs=[
            pl.BlockSpec((block_b, x_size), lambda i: (i, 0)),   # activations: tiled
            pl.BlockSpec((block_b, y_size), lambda i: (i, 0)),
            pl.BlockSpec((x_size, H), lambda i: (0, 0)),          # weights: resident
            pl.BlockSpec((y_size, H), lambda i: (0, 0)),
            pl.BlockSpec((1, H), lambda i: (0, 0)),
            pl.BlockSpec((H, H), lambda i: (0, 0)),
            pl.BlockSpec((1, H), lambda i: (0, 0)),
            pl.BlockSpec((1, H), lambda i: (0, 0)),
            pl.BlockSpec(memory_space=pltpu.SMEM),                # b3 scalar
        ],
        out_specs=pl.BlockSpec((block_b, 1), lambda i: (i, 0)),
        compiler_params=pltpu.CompilerParams(dimension_semantics=("parallel",)),
        cost_estimate=pl.CostEstimate(flops=flops, transcendentals=0,
                                      bytes_accessed=bytes_accessed),
    )(x, y, params["w1x"], params["w1y"], params["b1"], params["w2"],
      params["b2"], params["w3_row"], params["b3"])


# ------------------------------- mi kernel ---------------------------------
@jax.jit
def mine_mi(x, x1, y, params):
    """Equivalent of Mine.mi: batch-tiled, head-fused forward + in-kernel reductions."""
    B, x_size = x.shape
    y_size = y.shape[1]
    H = params["w2"].shape[0]

    w1x, w1y, b1 = params["w1x"], params["w1y"], params["b1"]
    w2, b2 = params["w2"], params["b2"]
    w3_row, b3 = params["w3_row"], params["b3"]

    # Lane-pack the two heads (x branch / x1 branch) with block-diagonal weights:
    # [x | x1] @ diag(w1x, w1x) computes both layer-1 x-branches in one MXU pass.
    zx = jnp.zeros_like(w1x)
    w1x_bd = jnp.concatenate(
        [jnp.concatenate([w1x, zx], axis=1),
         jnp.concatenate([zx, w1x], axis=1)], axis=0)            # [2*x_size, 2H]
    zh = jnp.zeros_like(w2)
    w2_bd = jnp.concatenate(
        [jnp.concatenate([w2, zh], axis=1),
         jnp.concatenate([zh, w2], axis=1)], axis=0)             # [2H, 2H]
    b2_cat = jnp.concatenate([b2, b2], axis=1)                   # [1, 2H]
    w3_cat = jnp.concatenate([w3_row, w3_row], axis=1)           # [1, 2H]

    # Batch tiling: bounded VMEM footprint, pipelined DMA; split into 2 "parallel"
    # chunks (v7x dual TensorCore) when there are at least 2 tiles.
    MAX_TILE = 4096
    if B <= 256:
        rows = _round_up(B, 8)
    else:
        rows = min(MAX_TILE, _round_up(pl.cdiv(B, 2), 8))
    num_tiles = pl.cdiv(B, rows)
    chunks = 2 if num_tiles >= 2 else 1
    tiles_per_chunk = pl.cdiv(num_tiles, chunks)
    grid = (chunks, tiles_per_chunk)

    def row_block(c, i):
        # Clamp so a padded tile slot (odd tile count) re-reads the last in-bounds tile;
        # its rows are fully masked in-kernel so it contributes nothing.
        t = jnp.minimum(c * tiles_per_chunk + i, num_tiles - 1)
        return (t, 0)

    def const_block(c, i):
        return (0, 0)

    def mi_kernel(x_ref, x1_ref, y_ref, w1xb_ref, w1y_ref, b1_ref, w2b_ref,
                  b2c_ref, w3c_ref, b3_ref, st_ref, se_ref):
        i = pl.program_id(1)

        @pl.when(i == 0)
        def _():
            st_ref[...] = jnp.zeros_like(st_ref)
            se_ref[...] = jnp.zeros_like(se_ref)

        # shared y branch: computed once per tile, lane-tiled to both heads
        yh = jnp.dot(y_ref[...], w1y_ref[...],
                     preferred_element_type=jnp.float32) + b1_ref[...]
        yh2 = jnp.concatenate([yh, yh], axis=-1)                       # [rows, 2H]

        xcat = jnp.concatenate([x_ref[...], x1_ref[...]], axis=-1)     # [rows, 2*x_size]
        h = _leaky_relu(jnp.dot(xcat, w1xb_ref[...],
                                preferred_element_type=jnp.float32) + yh2)
        h = _leaky_relu(jnp.dot(h, w2b_ref[...],
                                preferred_element_type=jnp.float32) + b2c_ref[...])
        prod = h * w3c_ref[...]                                        # [rows, 2H]
        t = _leaky_relu(jnp.sum(prod[:, :H], axis=-1, keepdims=True) + b3_ref[0])
        t1 = _leaky_relu(jnp.sum(prod[:, H:], axis=-1, keepdims=True) + b3_ref[0])

        # mask rows past the true batch (partial last tile / duplicated padded slot)
        tile_idx = pl.program_id(0) * tiles_per_chunk + i
        row_ids = tile_idx * rows + jax.lax.broadcasted_iota(jnp.int32, t.shape, 0)
        valid = row_ids < B
        st_ref[...] += jnp.sum(jnp.where(valid, t, 0.0), keepdims=True)[None]
        se_ref[...] += jnp.sum(jnp.where(valid, jnp.exp(t1), 0.0), keepdims=True)[None]

    flops = 2 * B * (2 * x_size * 2 * H + y_size * H + 4 * H * H + 2 * H)
    bytes_accessed = 4 * (B * (2 * x_size + y_size) + 8 * H * H)

    part_t, part_et1 = pl.pallas_call(
        mi_kernel,
        out_shape=(jax.ShapeDtypeStruct((chunks, 1, 1), jnp.float32),
                   jax.ShapeDtypeStruct((chunks, 1, 1), jnp.float32)),
        grid=grid,
        in_specs=[
            pl.BlockSpec((rows, x_size), row_block),
            pl.BlockSpec((rows, x_size), row_block),
            pl.BlockSpec((rows, y_size), row_block),
            pl.BlockSpec((2 * x_size, 2 * H), const_block),
            pl.BlockSpec((y_size, H), const_block),
            pl.BlockSpec((1, H), const_block),
            pl.BlockSpec((2 * H, 2 * H), const_block),
            pl.BlockSpec((1, 2 * H), const_block),
            pl.BlockSpec((1, 2 * H), const_block),
            pl.BlockSpec(memory_space=pltpu.SMEM),
        ],
        out_specs=(pl.BlockSpec((1, 1, 1), lambda c, i: (c, 0, 0)),
                   pl.BlockSpec((1, 1, 1), lambda c, i: (c, 0, 0))),
        compiler_params=pltpu.CompilerParams(
            dimension_semantics=("parallel", "arbitrary")),
        cost_estimate=pl.CostEstimate(flops=flops, transcendentals=B,
                                      bytes_accessed=bytes_accessed),
    )(x, x1, y, w1x_bd, w1y, b1, w2_bd, b2_cat, w3_cat, b3)

    t_mean = jnp.sum(part_t) / B
    et1_mean = jnp.sum(part_et1) / B
    # same formula as the PyTorch module: mean(t) - log(mean(exp(t1)) + 1e-8)
    return t_mean - jnp.log(et1_mean + 1e-8)


# ------------------------------ parameters ---------------------------------
def init_params(key, x_size=16, y_size=27, hidden_size=32):
    """Kaiming-normal (fan_in) weights, zero biases — matches the PyTorch init."""
    k1, k2, k3, k4 = jax.random.split(key, 4)

    def kaiming(k, fan_in, shape):
        return jax.random.normal(k, shape, jnp.float32) * jnp.sqrt(2.0 / fan_in)

    # stored as [in, out] so kernels compute act @ W
    return dict(
        w1x=kaiming(k1, x_size, (x_size, hidden_size)),
        w1y=kaiming(k2, y_size, (y_size, hidden_size)),
        b1=jnp.zeros((1, hidden_size), jnp.float32),         # fc1_bias
        w2=kaiming(k3, hidden_size, (hidden_size, hidden_size)),
        b2=jnp.zeros((1, hidden_size), jnp.float32),
        w3_row=kaiming(k4, hidden_size, (1, hidden_size)),   # fc3 weight as a row
        b3=jnp.zeros((1,), jnp.float32),                     # scalar bias -> SMEM
    )

# TODO(synk): Mine.mi_loss keeps a host-side moving-average (ma_et) Python scalar;
# that stateful bookkeeping is not a kernel op and is left out.


if __name__ == "__main__":
    key = jax.random.PRNGKey(0)
    X_SIZE, Y_SIZE, HIDDEN = 16, 27, 32
    params = init_params(jax.random.fold_in(key, 123), X_SIZE, Y_SIZE, HIDDEN)

    def ref_forward(xa, ya, p):
        lrelu = lambda v: jnp.where(v > 0, v, 0.2 * v)
        h = lrelu(xa @ p["w1x"] + ya @ p["w1y"] + p["b1"])
        h = lrelu(h @ p["w2"] + p["b2"])
        return lrelu(h @ p["w3_row"].T + p["b3"][0])

    def ref_mi(xa, x1a, ya, p):
        t = ref_forward(xa, ya, p)
        t1 = ref_forward(x1a, ya, p)
        return t.mean() - jnp.log(jnp.exp(t1).mean() + 1e-8)

    # small case (single tile) + larger case (multi-tile forward, 2-chunk mi with a
    # partial tile and a padded/duplicated tile slot) to exercise the masking paths.
    for B, tol in [(8, 1e-5), (10000, 5e-4)]:
        kx, kx1, ky = jax.random.split(jax.random.fold_in(key, B), 3)
        x = jax.random.normal(kx, (B, X_SIZE), jnp.float32)
        x1 = jax.random.normal(kx1, (B, X_SIZE), jnp.float32)
        y = jax.random.normal(ky, (B, Y_SIZE), jnp.float32)

        out = mine_forward(x, y, params)
        jax.block_until_ready(out)
        assert out.shape == (B, 1) and out.dtype == jnp.float32
        ref = ref_forward(x, y, params)
        assert jnp.allclose(out, ref, atol=tol, rtol=tol), f"forward mismatch at B={B}"

        mi_val = mine_mi(x, x1, y, params)
        jax.block_until_ready(mi_val)
        mi_ref = ref_mi(x, x1, y, params)
        assert jnp.allclose(mi_val, mi_ref, atol=tol, rtol=tol), f"mi mismatch at B={B}"

    print("KERNEL_OK")
</pallas_src>

<mosaic_0001>
module attributes {stable_mosaic.version = 11 : i64} {
  func.func @mine_fwd_kernel(%arg0: i32, %arg1: memref<8x16xf32, #tpu.memory_space<vmem>>, %arg2: memref<8x27xf32, #tpu.memory_space<vmem>>, %arg3: memref<16x32xf32, #tpu.memory_space<vmem>>, %arg4: memref<27x32xf32, #tpu.memory_space<vmem>>, %arg5: memref<1x32xf32, #tpu.memory_space<vmem>>, %arg6: memref<32x32xf32, #tpu.memory_space<vmem>>, %arg7: memref<1x32xf32, #tpu.memory_space<vmem>>, %arg8: memref<1x32xf32, #tpu.memory_space<vmem>>, %arg9: memref<1xf32, #tpu.memory_space<smem>>, %arg10: memref<8x1xf32, #tpu.memory_space<vmem>>) attributes {dimension_semantics = [#tpu.dimension_semantics<parallel>], iteration_bounds = array<i64: 1>, scalar_prefetch = 0 : i64, scratch_operands = 0 : i64, tpu.core_type = #tpu.core_type<tc>, window_params = [{transform_indices = @transform_0, window_bounds = array<i64: 8, 16>}, {transform_indices = @transform_1, window_bounds = array<i64: 8, 27>}, {pipeline_mode = #tpu.pipeline_mode<synchronous>, transform_indices = @transform_2, window_bounds = array<i64: 16, 32>}, {pipeline_mode = #tpu.pipeline_mode<synchronous>, transform_indices = @transform_3, window_bounds = array<i64: 27, 32>}, {pipeline_mode = #tpu.pipeline_mode<synchronous>, transform_indices = @transform_4, window_bounds = array<i64: 1, 32>}, {pipeline_mode = #tpu.pipeline_mode<synchronous>, transform_indices = @transform_5, window_bounds = array<i64: 32, 32>}, {pipeline_mode = #tpu.pipeline_mode<synchronous>, transform_indices = @transform_6, window_bounds = array<i64: 1, 32>}, {pipeline_mode = #tpu.pipeline_mode<synchronous>, transform_indices = @transform_7, window_bounds = array<i64: 1, 32>}, {transform_indices = @transform_8, window_bounds = array<i64: 1>}, {transform_indices = @transform_9, window_bounds = array<i64: 8, 1>}]} {
    %c0 = arith.constant 0 : index
    %c0_0 = arith.constant 0 : index
    %0 = vector.load %arg1[%c0, %c0_0] : memref<8x16xf32, #tpu.memory_space<vmem>>, vector<8x16xf32>
    %c0_1 = arith.constant 0 : index
    %c0_2 = arith.constant 0 : index
    %1 = vector.load %arg3[%c0_1, %c0_2] : memref<16x32xf32, #tpu.memory_space<vmem>>, vector<16x32xf32>
    %cst = arith.constant dense<0.000000e+00> : vector<8x32xf32>
    %2 = tpu.matmul %0, %1, %cst {dimension_numbers = #tpu.dot_dimension_numbers<[1], [0], [0], [1], [0, 0, 1, 1], [], []>} : vector<8x16xf32>, vector<16x32xf32>, vector<8x32xf32> -> vector<8x32xf32>
    %c0_3 = arith.constant 0 : index
    %c0_4 = arith.constant 0 : index
    %3 = vector.load %arg2[%c0_3, %c0_4] : memref<8x27xf32, #tpu.memory_space<vmem>>, vector<8x27xf32>
    %c0_5 = arith.constant 0 : index
    %c0_6 = arith.constant 0 : index
    %4 = vector.load %arg4[%c0_5, %c0_6] : memref<27x32xf32, #tpu.memory_space<vmem>>, vector<27x32xf32>
    %cst_7 = arith.constant dense<0.000000e+00> : vector<8x32xf32>
    %5 = tpu.matmul %3, %4, %cst_7 {dimension_numbers = #tpu.dot_dimension_numbers<[1], [0], [0], [1], [0, 0, 1, 1], [], []>} : vector<8x27xf32>, vector<27x32xf32>, vector<8x32xf32> -> vector<8x32xf32>
    %6 = arith.addf %2, %5 : vector<8x32xf32>
    %c0_8 = arith.constant 0 : index
    %c0_9 = arith.constant 0 : index
    %7 = vector.load %arg5[%c0_8, %c0_9] : memref<1x32xf32, #tpu.memory_space<vmem>>, vector<1x32xf32>
    %8 = vector.broadcast %7 : vector<1x32xf32> to vector<8x32xf32>
    %9 = arith.addf %6, %8 : vector<8x32xf32>
    %cst_10 = arith.constant 0.000000e+00 : f32
    %10 = vector.broadcast %cst_10 : f32 to vector<8x32xf32>
    %11 = arith.cmpf ogt, %9, %10 : vector<8x32xf32>
    %cst_11 = arith.constant 2.000000e-01 : f32
    %12 = vector.broadcast %cst_11 : f32 to vector<8x32xf32>
    %13 = arith.mulf %12, %9 : vector<8x32xf32>
    %14 = arith.select %11, %9, %13 : vector<8x32xi1>, vector<8x32xf32>
    %c0_12 = arith.constant 0 : index
    %c0_13 = arith.constant 0 : index
    %15 = vector.load %arg6[%c0_12, %c0_13] : memref<32x32xf32, #tpu.memory_space<vmem>>, vector<32x32xf32>
    %cst_14 = arith.constant dense<0.000000e+00> : vector<8x32xf32>
    %16 = tpu.matmul %14, %15, %cst_14 {dimension_numbers = #tpu.dot_dimension_numbers<[1], [0], [0], [1], [0, 0, 1, 1], [], []>} : vector<8x32xf32>, vector<32x32xf32>, vector<8x32xf32> -> vector<8x32xf32>
    %c0_15 = arith.constant 0 : index
    %c0_16 = arith.constant 0 : index
    %17 = vector.load %arg7[%c0_15, %c0_16] : memref<1x32xf32, #tpu.memory_space<vmem>>, vector<1x32xf32>
    %18 = vector.broadcast %17 : vector<1x32xf32> to vector<8x32xf32>
    %19 = arith.addf %16, %18 : vector<8x32xf32>
    %cst_17 = arith.constant 0.000000e+00 : f32
    %20 = vector.broadcast %cst_17 : f32 to vector<8x32xf32>
    %21 = arith.cmpf ogt, %19, %20 : vector<8x32xf32>
    %cst_18 = arith.constant 2.000000e-01 : f32
    %22 = vector.broadcast %cst_18 : f32 to vector<8x32xf32>
    %23 = arith.mulf %22, %19 : vector<8x32xf32>
    %24 = arith.select %21, %19, %23 : vector<8x32xi1>, vector<8x32xf32>
    %c0_19 = arith.constant 0 : index
    %c0_20 = arith.constant 0 : index
    %25 = vector.load %arg8[%c0_19, %c0_20] : memref<1x32xf32, #tpu.memory_space<vmem>>, vector<1x32xf32>
    %26 = vector.broadcast %25 : vector<1x32xf32> to vector<8x32xf32>
    %27 = arith.mulf %24, %26 : vector<8x32xf32>
    %cst_21 = arith.constant dense<0.000000e+00> : vector<8xf32>
    %28 = vector.multi_reduction <add>, %27, %cst_21 [1] : vector<8x32xf32> to vector<8xf32>
    %29 = vector.shape_cast %28 : vector<8xf32> to vector<8x1xf32>
    %c0_22 = arith.constant 0 : index
    %30 = memref.load %arg9[%c0_22] : memref<1xf32, #tpu.memory_space<smem>>
    %31 = vector.broadcast %30 : f32 to vector<8x1xf32>
    %32 = arith.addf %29, %31 : vector<8x1xf32>
    %cst_23 = arith.constant 0.000000e+00 : f32
    %33 = vector.broadcast %cst_23 : f32 to vector<8x1xf32>
    %34 = arith.cmpf ogt, %32, %33 : vector<8x1xf32>
    %cst_24 = arith.constant 2.000000e-01 : f32
    %35 = vector.broadcast %cst_24 : f32 to vector<8x1xf32>
    %36 = arith.mulf %35, %32 : vector<8x1xf32>
    %37 = arith.select %34, %32, %36 : vector<8x1xi1>, vector<8x1xf32>
    %c0_25 = arith.constant 0 : index
    %c0_26 = arith.constant 0 : index
    %38 = vector.load %arg10[%c0_25, %c0_26] : memref<8x1xf32, #tpu.memory_space<vmem>>, vector<8x1xf32>
    tpu.vector_store %arg10[%c0_25, %c0_26], %37 {strides = array<i32>} : memref<8x1xf32, #tpu.memory_space<vmem>>, vector<8x1xf32>,
    return
  }
  func.func @transform_0(%arg0: i32) -> (i32, i32) {
    %c0_i32 = arith.constant 0 : i32
    %c0_i32_0 = arith.constant 0 : i32
    return %arg0, %c0_i32 : i32, i32
  }
  func.func @transform_1(%arg0: i32) -> (i32, i32) {
    %c0_i32 = arith.constant 0 : i32
    %c0_i32_0 = arith.constant 0 : i32
    return %arg0, %c0_i32 : i32, i32
  }
  func.func @transform_2(%arg0: i32) -> (i32, i32) {
    %c0_i32 = arith.constant 0 : i32
    %c0_i32_0 = arith.constant 0 : i32
    %c0_i32_1 = arith.constant 0 : i32
    return %c0_i32, %c0_i32_0 : i32, i32
  }
  func.func @transform_3(%arg0: i32) -> (i32, i32) {
    %c0_i32 = arith.constant 0 : i32
    %c0_i32_0 = arith.constant 0 : i32
    %c0_i32_1 = arith.constant 0 : i32
    return %c0_i32, %c0_i32_0 : i32, i32
  }
  func.func @transform_4(%arg0: i32) -> (i32, i32) {
    %c0_i32 = arith.constant 0 : i32
    %c0_i32_0 = arith.constant 0 : i32
    %c0_i32_1 = arith.constant 0 : i32
    return %c0_i32, %c0_i32_0 : i32, i32
  }
  func.func @transform_5(%arg0: i32) -> (i32, i32) {
    %c0_i32 = arith.constant 0 : i32
    %c0_i32_0 = arith.constant 0 : i32
    %c0_i32_1 = arith.constant 0 : i32
    return %c0_i32, %c0_i32_0 : i32, i32
  }
  func.func @transform_6(%arg0: i32) -> (i32, i32) {
    %c0_i32 = arith.constant 0 : i32
    %c0_i32_0 = arith.constant 0 : i32
    %c0_i32_1 = arith.constant 0 : i32
    return %c0_i32, %c0_i32_0 : i32, i32
  }
  func.func @transform_7(%arg0: i32) -> (i32, i32) {
    %c0_i32 = arith.constant 0 : i32
    %c0_i32_0 = arith.constant 0 : i32
    %c0_i32_1 = arith.constant 0 : i32
    return %c0_i32, %c0_i32_0 : i32, i32
  }
  func.func @transform_8(%arg0: i32) -> i32 {
    %c0_i32 = arith.constant 0 : i32
    %c0_i32_0 = arith.constant 0 : i32
    return %c0_i32 : i32
  }
  func.func @transform_9(%arg0: i32) -> (i32, i32) {
    %c0_i32 = arith.constant 0 : i32
    %c0_i32_0 = arith.constant 0 : i32
    return %arg0, %c0_i32 : i32, i32
  }
}

</mosaic_0001>

<bundles_post_ra>
// kernel: mine_forward.1
= control target key start
LH: loop header
LB: loop body
LE: loop exit
PB: predicated region body
PF: predicated region fallthrough
CT: control target
= control target key end

     0   :  { %15 = vsyncpa [#allocation4], 0  ;;  %s647_s0 = inlined_call_operand.hbm [shape: f32[8,16], index: 0, kind: input, shape index: {}]   ;;  %s648_s1 = inlined_call_operand.hbm [shape: f32[8,27], index: 1, kind: input, shape index: {}]   ;;  %s649_s2 = inlined_call_operand.hbm [shape: f32[16,32], index: 2, kind: input, shape index: {}]   ;;  %s650_s3 = inlined_call_operand.hbm [shape: f32[27,32], index: 3, kind: input, shape index: {}]   ;;  %s651_s4 = inlined_call_operand.vmem [shape: f32[1,32], index: 4, kind: input, shape index: {}]   ;;  %s652_s5 = inlined_call_operand.hbm [shape: f32[32,32], index: 5, kind: input, shape index: {}]   ;;  %s653_s6 = inlined_call_operand.vmem [shape: f32[1,32], index: 6, kind: input, shape index: {}]   ;;  %s654_s7 = inlined_call_operand.vmem [shape: f32[1,32], index: 7, kind: input, shape index: {}]   ;;  %s655_s8 = inlined_call_operand.<no memory space> [shape: f32[1], index: 8, kind: input, shape index: {}]   ;;  %s656_s9 = inlined_call_operand.vmem [shape: f32[8,1], index: 9, kind: output, shape index: {}]  }
   0x1   :  { %16 = vsyncpa [#allocation6], 0 }
   0x2   :  { %17 = vsyncpa [#allocation9], 0  ;;  %s546_s30 = smov [#allocation5]  }
   0x3   :  { %s34_s10 = sshll.u32 %s546_s30, 4  ;;  %s35_s10 = int_to_ptr.vmem [resolvable:$true] %s34_s10 }
   0x4   :  { %s448_s11 = scalar_lea.vmem %s35_s10, 128  ;;  %p453_p1 = scmp.lt.s32.totalorder %s35_s10, %s35_s10 }
   0x5   :  { %p449_p0 = scmp.ne.s32.totalorder %s35_s10, %s448_s11  ;;  %p454_p2 = scmp.lt.s32.totalorder %s448_s11, %s448_s11 }
   0x7   :  { %p455_p3 = por %p454_p2, %p453_p1 }
   0x9   :  { %p456_p4 = pnand %p455_p3, %p449_p0 }
   0xb   :  { %459 = shalt.err (!%p456_p4)
}
   0xc   :  { %37 = dma.hbm_to_vmem [thread:$0]  %s648_s1, 128, %s35_s10, [#allocation6]  }
   0xd   :  { %s547_s14 = smov [#allocation8]   ;;  %s548_s16 = smov [#allocation3]  }
   0xe   :  { %s55_s15 = sshll.u32 %s547_s14, 4  ;;  %s24_s17 = sshll.u32 %s548_s16, 4  ;;  %s56_s15 = int_to_ptr.vmem [resolvable:$true] %s55_s15  ;;  %s25_s17 = int_to_ptr.vmem [resolvable:$true] %s24_s17 }
   0xf   :  { %s468_s18 = scalar_lea.vmem %s56_s15, 512  ;;  %p473_p6 = scmp.lt.s32.totalorder %s56_s15, %s56_s15 }
  0x10   :  { %p469_p5 = scmp.ne.s32.totalorder %s56_s15, %s468_s18  ;;  %p474_p7 = scmp.lt.s32.totalorder %s468_s18, %s468_s18 }
  0x12   :  { %p475_p8 = por %p474_p7, %p473_p6 }
  0x14   :  { %p476_p9 = pnand %p475_p8, %p469_p5 }
  0x16   :  { %479 = shalt.err (!%p476_p9)
}
  0x17   :  { %s549_s19 = smov 128   ;;  %s550_s20 = smov 8  }
  0x18   :  { %61 = dma.hbm_to_vmem [thread:$0]  %s650_s3, 512, %s56_s15, [#allocation9], %s549_s19, %s549_s19, %s550_s20  }
  0x19   :  { %s488_s1 = scalar_lea.vmem %s25_s17, 128  ;;  %p493_p11 = scmp.lt.s32.totalorder %s25_s17, %s25_s17 }
  0x1a   :  { %p489_p10 = scmp.ne.s32.totalorder %s25_s17, %s488_s1  ;;  %p494_p12 = scmp.lt.s32.totalorder %s488_s1, %s488_s1 }
  0x1c   :  { %p495_p13 = por %p494_p12, %p493_p11 }
  0x1e   :  { %p496_p0 = pnand %p495_p13, %p489_p10 }
  0x20   :  { %499 = shalt.err (!%p496_p0)
}
  0x21   :  { %27 = dma.hbm_to_vmem [thread:$0]  %s647_s0, 128, %s25_s17, [#allocation4]  }
  0x22   :  { %s551_s25 = smov [#allocation7]   ;;  %s552_s27 = smov [#allocation10]  }
  0x23   :  { %s43_s26 = sshll.u32 %s551_s25, 4  ;;  %s69_s28 = sshll.u32 %s552_s27, 4  ;;  %s44_s26 = int_to_ptr.vmem [resolvable:$true] %s43_s26  ;;  %s70_s28 = int_to_ptr.vmem [resolvable:$true] %s69_s28 }
  0x24   :  { %s508_s29 = scalar_lea.vmem %s44_s26, 256  ;;  %p513_p2 = scmp.lt.s32.totalorder %s44_s26, %s44_s26 }
  0x25   :  { %p509_p1 = scmp.ne.s32.totalorder %s44_s26, %s508_s29  ;;  %p514_p3 = scmp.lt.s32.totalorder %s508_s29, %s508_s29 }
  0x27   :  { %p515_p4 = por %p514_p3, %p513_p2 }
  0x29   :  { %p516_p5 = pnand %p515_p4, %p509_p1 }
  0x2b   :  { %519 = shalt.err (!%p516_p5)
}
  0x2c   :  { %49 = dma.hbm_to_vmem [thread:$0]  %s649_s2, 256, %s44_s26, [#allocation6], %s549_s19, %s549_s19, %s550_s20  }
  0x2d   :  { %s528_s0 = scalar_lea.vmem %s70_s28, 512  ;;  %p533_p7 = scmp.lt.s32.totalorder %s70_s28, %s70_s28 }
  0x2e   :  { %p529_p6 = scmp.ne.s32.totalorder %s70_s28, %s528_s0  ;;  %p534_p8 = scmp.lt.s32.totalorder %s528_s0, %s528_s0 }
  0x30   :  { %p535_p9 = por %p534_p8, %p533_p7 }
  0x32   :  { %p536_p10 = pnand %p535_p9, %p529_p6 }
  0x34   :  { %539 = shalt.err (!%p536_p10)
}
  0x35   :  { %75 = dma.hbm_to_vmem [thread:$0]  %s652_s5, 512, %s70_s28, [#allocation9], %s549_s19, %s549_s19, %s550_s20  }
  0x36   :  { %540 = dma.done.wait [#allocation4], 128  }
  0x37   :  { %541 = vsyncadd [#allocation4], 4294967168 }
  0x38   :  { %542 = dma.done.wait [#allocation6], 384  }
  0x39   :  { %543 = vsyncadd [#allocation6], 4294966912 }
  0x3a   :  { %544 = dma.done.wait [#allocation9], 1024  }
  0x3b   :  { %545 = vsyncadd [#allocation9], 4294966272  ;;  %v553_v0 = vmov 0.0   ;;  %vm554_vm0 = vmmov 0   ;;  %vm109_vm1 = vcmask 1042432   ;;  %v103_v2 = vld [vmem:[#allocation8 + $0x10] sm:$0xff]  ;;  %v368_v31 = vstv %s655_s8 }
  0x3c   :  { %402 = vmatprep.subr.mxu0 %v553_v0  ;;  %413 = vmatprep.subr.mxu1 %v553_v0  ;;  %v104_v1 = vld [vmem:[#allocation8 + $0x18] sm:$0x7]  ;;  %v98_v4 = vld [vmem:[#allocation7] sm:$0xff]  ;;  %v97_v5 = vld [vmem:[#allocation3] sm:$0xff]  ;;  %vm183_vm2 = vcmask 130048   ;;  %vm105_vm3 = vcmask 220160  }
  0x3d   :  { %417 = vmatprep.mubr.msk.f32.mxu1 %vm554_vm0, %v553_v0  ;;  %410 = vmatprep.mubr.msk.f32.mxu0 %vm554_vm0, %v553_v0  ;;  %v99_v3 = vld [vmem:[#allocation7 + $0x8] sm:$0xff]  ;;  %v102_v6 = vld [vmem:[#allocation8 + $0x8] sm:$0xff]  ;;  %v101_v7 = vld [vmem:[#allocation8] sm:$0xff]  ;;  %vm279_vm5 = vcmask 261120   ;;  %vm373_vm8 = vcmask 7168  }
  0x3e   :  { %403 = vmatpush3.msk.msra.mxu0 %vm109_vm1, %v104_v1  ;;  %414 = vmatpush3.msra.mxu1 %v99_v3  ;;  %v100_v8 = vld [vmem:[#allocation5] sm:$0xff]  ;;  %v271_v9 = vld [vmem:[#allocation10 + $0x18] sm:$0xff]  ;;  %v270_v10 = vld [vmem:[#allocation10 + $0x10] sm:$0xff] }
  0x3f   :  { %404 = vmatprep.subr.mxu0 %v553_v0  ;;  %415 = vmatprep.subr.mxu1 %v553_v0  ;;  %v269_v11 = vld [vmem:[#allocation10 + $0x8] sm:$0xff]  ;;  %v268_v12 = vld [vmem:[#allocation10] sm:$0xff] }
  0x40   :  { %405 = vmatpush3.msra.mxu0 %v103_v2  ;;  %416 = vmatpush3.msra.mxu1 %v98_v4  ;;  %v385_v16 = vld [vmem:[%s651_s4] ss:$0 sm:$0xff] }
  0x41   :  { %406 = vmatprep.subr.mxu0 %v553_v0  ;;  %418 = vmatmul.mubr.msk.f32.vlgmr.msra.gmra.mxu1 %vm183_vm2, %v97_v5  ;;  %v386_v22 = vld [vmem:[%s653_s6] ss:$0 sm:$0xff] }
  0x42   :  { %407 = vmatpush3.msra.mxu0 %v102_v6  ;;  %420 = vmatprep.subr.mxu1 %v553_v0  ;;  %v388_v27 = vld [vmem:[%s654_s7] ss:$0 sm:$0xff] }
  0x43   :  { %408 = vmatprep.subr.mxu0 %v553_v0  ;;  %428 = vmatprep.mubr.msk.f32.mxu1 %vm554_vm0, %v553_v0 }
  0x44   :  { %409 = vmatpush3.msra.mxu0 %v101_v7  ;;  %421 = vmatpush3.msra.mxu1 %v271_v9 }
  0x45   :  { %411 = vmatmul.mubr.msk.f32.vlgmr.msra.gmra.mxu0 %vm105_vm3, %v100_v8  ;;  %422 = vmatprep.subr.mxu1 %v553_v0 }
  0x46   :  { %423 = vmatpush3.msra.mxu1 %v270_v10 }
  0x47   :  { %424 = vmatprep.subr.mxu1 %v553_v0 }
  0x48   :  { %425 = vmatpush3.msra.mxu1 %v269_v11 }
  0x49   :  { %426 = vmatprep.subr.mxu1 %v553_v0 }
  0x4a   :  { %427 = vmatpush3.msra.mxu1 %v268_v12 }
 0x101   :  { %v253_v13 = vpop.f32.mrf.mxu1 }
 0x103   :  { %v419_v14 = vpop.f32.mrf.mxu1 }
 0x105   :  { %v179_v15 = vpop.f32.mrf.mxu0 }
 0x106   :  { %v254_v17 = vadd.f32 %v253_v13, %v179_v15 }
 0x107   :  { %v412_v18 = vpop.f32.mrf.mxu0 }
 0x108   :  { %v264_v19 = vadd.f32 %v385_v16, %v254_v17 }
 0x10a   :  { %vm265_vm4 = vcmp.gt.f32.partialorder %v264_v19, 0.0  ;;  %v266_v20 = vmul.f32 0.2, %v264_v19 }
 0x10c   :  { %v267_v21 = vsel %vm265_vm4, %v264_v19, %v266_v20 }
 0x10d   :  { %429 = vmatmul.mubr.msk.f32.vlgmr.msra.gmra.mxu1 %vm279_vm5, %v267_v21 }
 0x1cd   :  { %v349_v23 = vpop.f32.mrf.mxu1 }
 0x1ce   :  { %v350_v24 = vadd.f32 %v386_v22, %v349_v23 }
 0x1cf   :  { %v430_v25 = vpop.f32.mrf.mxu1 }
 0x1d0   :  { %v354_v26 = vmul.f32 0.2, %v350_v24  ;;  %vm353_vm6 = vcmp.gt.f32.partialorder %v350_v24, 0.0 }
 0x1d2   :  { %v355_v28 = vsel %vm353_vm6, %v350_v24, %v354_v26 }
 0x1d3   :  { %v363_v29 = vmul.f32 %v388_v27, %v355_v28 }
 0x1d5   :  { %v364_v30 = vsel %vm279_vm5, %v363_v29, 0.0 }
 0x1d6   :  { %365 = vadd.xlane.f32.xlu0 %v364_v30 }
 0x25f   :  { %v366_v32 = vpop.xlane.xlu0 %365 }
 0x260   :  { %v369_v33 = vadd.f32 %v368_v31, %v366_v32 }
 0x262   :  { %vm370_vm7 = vcmp.gt.f32.partialorder %v369_v33, 0.0  ;;  %v371_v34 = vmul.f32 0.2, %v369_v33 }
 0x264   :  { %v372_v35 = vsel %vm370_vm7, %v369_v33, %v371_v34 }
 0x265   :  { %374 = vst.msk [vmem:[%s656_s9] sm:$0xff] %vm373_vm8, %v372_v35 }
 0x266   :  { %379 = vsyncpa [#allocation4], 1 }
 0x267   :  { %380 = vsyncpa [#allocation6], 1 }
 0x268   :  { %381 = vsyncpa [#allocation9], 1 }

</bundles_post_ra>
